<compile_context>
chip_gen: v7x
topology: tpu7x:2x2x1
jax: 0.10.0
libtpu: 0.0.40
codegen_flags: <defaults>
</compile_context>

<pallas_src>
from typing import Any, Callable

import jax
import jax.numpy as jnp
from jax.experimental import pallas as pl
from jax.experimental.pallas import tpu as pltpu


class Lambda:
    """JAX analogue of refiners.fluxion.layers.chain.Lambda."""

    def __init__(self, func: Callable[..., Any]) -> None:
        self.func = func

    def __call__(self, *args: Any) -> Any:
        return self.func(*args)

    def __str__(self) -> str:
        func_name = getattr(self.func, "__name__", "partial_function")
        return f"Lambda({func_name})"


# ---------------------------------------------------------------------------
# The wrapped callable: elementwise x + 1, hot path in a Pallas kernel.
# ---------------------------------------------------------------------------

_LANES = 128
_MAX_COLS = 8192                      # widest lane-dense slab we consider
_TARGET_BLOCK_BYTES = 4 * 1024 * 1024  # ~4 MiB/buffer: safe on v5e/v6e/v7x
_BYPASS_BYTES = 512 * 1024             # below this, plain XLA add fuses better
_VMEM_LIMIT_MIN = 16 << 20
_VMEM_LIMIT_MAX = 48 << 20             # leave headroom on v7x (64 MiB physical)


def _sublane_multiple(dtype) -> int:
    """Minimum sublane multiple for a dtype: f32->8, bf16->16, int8/fp8->32."""
    itemsize = jnp.dtype(dtype).itemsize
    return max(8, 32 // max(itemsize, 1))


def _add_one_kernel(x_ref, o_ref):
    # Weak-typed +1 keeps the input dtype (f32 / bf16 / int).
    o_ref[...] = x_ref[...] + 1


def _add_one_2d(x2d: jax.Array) -> jax.Array:
    """Elementwise +1 on a lane-dense 2D slab via pallas_call."""
    rows, cols = x2d.shape
    itemsize = jnp.dtype(x2d.dtype).itemsize
    sub = _sublane_multiple(x2d.dtype)

    # Target ~4 MiB input blocks; round row count down to the sublane multiple.
    rows_for_target = max(sub, (_TARGET_BLOCK_BYTES // (cols * itemsize)) // sub * sub)
    tile_rows = min(rows, rows_for_target)

    # Never emit grid=(1,): split into >=2 row-blocks so both v7x TensorCores
    # get work under dimension_semantics=("parallel",).
    if rows >= 2 * sub:
        half_rounded_up = (((rows + 1) // 2) + sub - 1) // sub * sub
        tile_rows = min(tile_rows, half_rounded_up)

    grid = (pl.cdiv(rows, tile_rows),)  # ragged last block handled by Pallas

    total = rows * cols
    tile_bytes = tile_rows * cols * itemsize
    # in + out, double-buffered, plus headroom; clamp well below v7x VMEM.
    vmem_limit = int(min(_VMEM_LIMIT_MAX, max(_VMEM_LIMIT_MIN, 6 * tile_bytes)))

    # NOTE: pipeline_mode=pl.Buffered(3) on the input spec is a possible v7x
    # micro-win (smoother DMA pipeline); left at the default 2-deep buffering
    # here to keep the kernel portable across JAX versions.
    return pl.pallas_call(
        _add_one_kernel,
        out_shape=jax.ShapeDtypeStruct((rows, cols), x2d.dtype),
        grid_spec=pltpu.PrefetchScalarGridSpec(
            num_scalar_prefetch=0,
            grid=grid,
            in_specs=[pl.BlockSpec((tile_rows, cols), lambda i: (i, 0))],
            out_specs=pl.BlockSpec((tile_rows, cols), lambda i: (i, 0)),
        ),
        compiler_params=pltpu.CompilerParams(
            dimension_semantics=("parallel",),
            vmem_limit_bytes=vmem_limit,
        ),
        cost_estimate=pl.CostEstimate(
            flops=total,
            transcendentals=0,
            bytes_accessed=2 * total * itemsize,
        ),
        input_output_aliases={0: 0},  # same shape/dtype: reuse donated input buffer
    )(x2d)


def add_one(x: jax.Array) -> jax.Array:
    """Elementwise x + 1 for an arbitrary-shaped tensor (e.g. NCHW)."""
    dt = x.dtype
    numeric = jnp.issubdtype(dt, jnp.floating) or jnp.issubdtype(dt, jnp.integer)
    total = x.size
    itemsize = jnp.dtype(dt).itemsize

    # Small / lane-incompatible / non-numeric inputs: a plain XLA add fuses
    # into neighboring ops and beats a dedicated HBM pass + kernel launch.
    if (not numeric) or total * itemsize < _BYPASS_BYTES or total % _LANES != 0:
        return x + 1

    # Widest lane-dense column count: largest divisor of `total` that is a
    # multiple of 128, capped at _MAX_COLS.
    m = total // _LANES
    cols = _LANES
    for d in range(_MAX_COLS // _LANES, 0, -1):
        if m % d == 0:
            cols = d * _LANES
            break
    rows = total // cols

    out2d = _add_one_2d(x.reshape(rows, cols))
    return out2d.reshape(x.shape)


if __name__ == "__main__":
    key = jax.random.PRNGKey(0)
    k0, k1, k2 = jax.random.split(key, 3)
    lambda_layer = Lambda(add_one)

    # Small NCHW input, consistent with typical usage inside a Chain (hits the
    # XLA-fusion bypass on purpose).
    x = jax.random.normal(k0, (2, 4, 16, 16), dtype=jnp.float32)
    out = jax.block_until_ready(lambda_layer(x))
    assert out.shape == x.shape and out.dtype == x.dtype
    assert jnp.allclose(out, x + 1.0, atol=1e-6), "mismatch vs reference (NCHW small)"

    # Image-sized f32 input: exercises the Pallas path with the divisor-based
    # lane width (7168), a 2-step parallel grid, and a ragged last block.
    x2 = jax.random.normal(k1, (1, 3, 224, 224), dtype=jnp.float32)
    out2 = jax.block_until_ready(lambda_layer(x2))
    assert out2.shape == x2.shape and out2.dtype == x2.dtype
    assert jnp.allclose(out2, x2 + 1.0, atol=1e-6), "mismatch vs reference (f32 pallas)"

    # bf16 path (dtype-aware sublane handling) through the Pallas kernel.
    x3 = jax.random.normal(k2, (2, 8, 128, 128), dtype=jnp.bfloat16)
    out3 = jax.block_until_ready(lambda_layer(x3))
    assert out3.dtype == jnp.bfloat16
    assert jnp.allclose(out3.astype(jnp.float32), x3.astype(jnp.float32) + 1.0,
                        atol=1e-2), "mismatch vs reference (bf16 pallas)"

    # Docstring's exact example values (tiny-input bypass).
    small = jnp.array([1.0, 2.0, 3.0], dtype=jnp.float32)
    small_out = jax.block_until_ready(lambda_layer(small))
    assert jnp.allclose(small_out, jnp.array([2.0, 3.0, 4.0])), "docstring example failed"

    print("KERNEL_OK")
</pallas_src>

<mosaic_0001>
module attributes {stable_mosaic.version = 11 : i64} {
  func.func @_add_one_kernel(%arg0: i32, %arg1: memref<16x7168xf32, #tpu.memory_space<vmem>>, %arg2: memref<16x7168xf32, #tpu.memory_space<vmem>>) attributes {dimension_semantics = [#tpu.dimension_semantics<parallel>], iteration_bounds = array<i64: 2>, scalar_prefetch = 0 : i64, scratch_operands = 0 : i64, tpu.core_type = #tpu.core_type<tc>, window_params = [{transform_indices = @transform_0, window_bounds = array<i64: 16, 7168>}, {transform_indices = @transform_1, window_bounds = array<i64: 16, 7168>}]} {
    %c0 = arith.constant 0 : index
    %c0_0 = arith.constant 0 : index
    %0 = vector.load %arg1[%c0, %c0_0] : memref<16x7168xf32, #tpu.memory_space<vmem>>, vector<16x7168xf32>
    %cst = arith.constant 1.000000e+00 : f32
    %1 = vector.broadcast %cst : f32 to vector<16x7168xf32>
    %2 = arith.addf %0, %1 : vector<16x7168xf32>
    %c0_1 = arith.constant 0 : index
    %c0_2 = arith.constant 0 : index
    %3 = vector.load %arg2[%c0_1, %c0_2] : memref<16x7168xf32, #tpu.memory_space<vmem>>, vector<16x7168xf32>
    tpu.vector_store %arg2[%c0_1, %c0_2], %2 {strides = array<i32>} : memref<16x7168xf32, #tpu.memory_space<vmem>>, vector<16x7168xf32>,
    return
  }
  func.func @transform_0(%arg0: i32) -> (i32, i32) {
    %c0_i32 = arith.constant 0 : i32
    %c0_i32_0 = arith.constant 0 : i32
    return %arg0, %c0_i32 : i32, i32
  }
  func.func @transform_1(%arg0: i32) -> (i32, i32) {
    %c0_i32 = arith.constant 0 : i32
    %c0_i32_0 = arith.constant 0 : i32
    return %arg0, %c0_i32 : i32, i32
  }
}

</mosaic_0001>

<bundles_post_ra>
// kernel: tpu_custom_call.1
= control target key start
LH: loop header
LB: loop body
LE: loop exit
PB: predicated region body
PF: predicated region fallthrough
CT: control target
= control target key end

     0   :  { %6 = vsyncpa [#allocation3], 0  ;;  %s1164_s0 = inlined_call_operand.hbm [shape: f32[21,7168], index: 0, kind: input, shape index: {}, may-alias: {0,1}]   ;;  %s1165_s1 = inlined_call_operand.hbm [shape: f32[21,7168], index: 1, kind: output, shape index: {}, may-alias: {0,1}]  }
   0x1   :  { %8 = vsyncpa [#allocation3 + $0x1], 0 }
   0x2   :  { %9 = vsyncpa [#allocation4], 0 }
   0x3   :  { %11 = vsyncpa [#allocation4 + $0x1], 0  ;;  %s765_s6 = smov 0   ;;  %s767_s7 = smov 0  }
   0x4   :  { %s769_s8 = smov 0   ;;  %s771_s9 = smov 0  }
   0x5 LB: > { %s786_s10 = sadd.s32 4294967295, %s747_s9   ;;  %s586_s11 = sadd.s32 4294967294, %s747_s9   ;;  %s747_s9 = sphi %s771_s9, %s1175_s9   ;;  %s743_s8 = sphi %s769_s8, %s1174_s8   ;;  %s739_s7 = sphi %s767_s7, %s1173_s7   ;;  %s735_s6 = sphi %s765_s6, %s1172_s6  }
   0x6   : > { %s790_s12 = sadd.s32 1, %s747_s9   ;;  %s24_s13 = sadd.s32 1, %s743_s8 }
   0x7   : > { %s21_s14 = ssub.s32 %s747_s9, %s790_s12  ;;  %p31_p0 = scmp.ne.s32.totalorder %s743_s8, %s739_s7 }
   0x8   : > { %p22_p1 = scmp.eq.s32.totalorder %s21_s14, 0  ;;  %p32_p2 = scmp.eq.s32.totalorder %s747_s9, 0 }
   0x9   : > { %p37_p3 = scmp.ne.s32.totalorder %s739_s7, %s735_s6  ;;  %p38_p4 = scmp.eq.s32.totalorder %s786_s10, 0 }
   0xa   : > { %s802_s15 = scalar_select %p22_p1, %s743_s8, %s24_s13  }
   0xb   : > { %p33_p5 = por %p32_p2, %p31_p0  ;;  %p804_p6 = por %p38_p4, %p37_p3 }
   0xc   : > { %p61_p7 = scmp.eq.s32.totalorder %s786_s10, 1  ;;  %p67_p8 = scmp.eq.s32.totalorder %s586_s11, 1 }
   0xd   : > { %p1166_p11 = scmp.ge.s32.totalorder %s747_s9, 2 }
   0xe   : > { %p809_p9 = por %p61_p7, %p31_p0  ;;  %p813_p10 = por %p67_p8, %p37_p3 }
   0xf   : > { %83 = sbr.rel (%p1166_p11) target bundleno = 58 (0x3a), region = 16 }
  0x10   : > { %s1169_s18 = scalar_select %p813_p10, 1, 0 }
  0x16   : > { %86 = sbr.rel (!%p33_p5) target bundleno = 58 (0x3a), region = 20  ;;  %s87_s19 = sand.u32 (%p33_p5), 1, %s743_s8  }
  0x17   : > { %s589_s20 = sshll.u32 (%p33_p5), %s747_s9, 1  ;;  %s606_s21 = smul.u32 (%p33_p5), 896, %s87_s19 }
  0x18   : > { %s93_s22 = ssub.s32 (%p33_p5), 3, %s589_s20  ;;  %s825_s25 = scalar_lea.sflag (%p33_p5), [#allocation3], %s87_s19 }
  0x19   : > { %p94_p12 = scmp.lt.s32.totalorder (%p33_p5), %s93_s22, 2  ;;  %s91_s26 = scalar_lea.vmem (%p33_p5), [#allocation2], %s606_s21 }
  0x1d   : > { %s1177_s22 = smov (!%p94_p12, %s93_s22), 2 }
  0x1e   : > { %s822_s23 = smul.u32 7168, %s1177_s22 }
  0x20   : > { %s99_s24 = ssub.s32 14336, %s822_s23 }
  0x21   : > { %100 = vsyncadd %s825_s25, %s99_s24  ;;  %p592_p13 = scmp.ne.s32.totalorder %s822_s23, 0  ;;  %s607_s27 = smul.u32 14336, %s747_s9 }
  0x22   : > { %s106_s28 = sshll.u32 %s91_s26, 4  ;;  %s657_s11 = scalar_lea.hbm %s1164_s0, 21504  ;;  %s835_s28 = int_to_ptr.vmem [resolvable:$true] %s106_s28 }
  0x23   : > { %s833_s2 = scalar_lea.hbm %s1164_s0, %s607_s27 }
  0x24   : > { %s653_s3 = scalar_lea.hbm %s833_s2, %s822_s23  ;;  %p658_p3 = scmp.lt.u32.totalorder %s833_s2, %s1164_s0 }
  0x25   : > { %p654_p0 = scmp.ne.s32.totalorder %s833_s2, %s653_s3  ;;  %p659_p4 = scmp.lt.u32.totalorder %s657_s11, %s653_s3 }
  0x26   : > { %p661_p7 = scmp.lt.u32.totalorder %s653_s3, %s833_s2 }
  0x27   : > { %p655_p1 = pnand %p654_p0, %p592_p13  ;;  %p660_p5 = por %p659_p4, %p658_p3 }
  0x29   : > { %p656_p2 = pneg %p655_p1  ;;  %p662_p8 = por %p661_p7, %p660_p5 }
  0x2b   : > { %p663_p12 = pnand %p662_p8, %p656_p2 }
  0x2d   : > { %666 = shalt.err (!%p663_p12)
}
  0x2e   : > { %s667_s19 = scalar_lea.vmem %s835_s28, %s822_s23  ;;  %s749_s20 = smov [#allocation2]  }
  0x2f   : > { %p668_p0 = scmp.ne.s32.totalorder %s835_s28, %s667_s19  ;;  %s671_s21 = sshll.u32 %s749_s20, 4  ;;  %s672_s21 = int_to_ptr.vmem [resolvable:$false] %s671_s21 }
  0x30   : > { %s673_s22 = scalar_lea.vmem %s672_s21, 28672  ;;  %p674_p10 = scmp.lt.s32.totalorder %s835_s28, %s672_s21 }
  0x31   : > { %p669_p1 = pnand %p668_p0, %p592_p13  ;;  %p675_p3 = scmp.lt.s32.totalorder %s673_s22, %s667_s19 }
  0x33   : > { %p670_p11 = pneg %p669_p1  ;;  %p676_p4 = por %p675_p3, %p674_p10 }
  0x35   : > { %p677_p5 = pnand %p676_p4, %p670_p11 }
  0x37   : > { %680 = shalt.err (!%p677_p5)
}
  0x38   : > { %s750_s24 = smov 7168   ;;  %s751_s26 = smov 448  }
  0x39   : > { %112 = dma.hbm_to_vmem [thread:$0]  (%p592_p13), %s833_s2, %s822_s23, %s835_s28, %s825_s25, %s750_s24, %s750_s24, %s751_s26  }
  0x3a PF: > { %p596_p2 = scmp.ge.s32.totalorder %s747_s9, 1  ;;  %p114_p7 = scmp.lt.s32.totalorder %s747_s9, 3 }
  0x3c   : > { %p115_p8 = pnand %p596_p2, %p114_p7 }
  0x3d   : > { %s865_s27 = sand.u32 (!%p115_p8), 1, %s739_s7  }
  0x3e   : > { %118 = sbr.rel (%p115_p8) target bundleno = 161 (0xa1), region = 24  ;;  %s121_s30 = scalar_lea.sflag (!%p115_p8), [#allocation3], %s865_s27 }
  0x3f   : > { %s608_s29 = smul.u32 (!%p115_p8), 896, %s865_s27 }
  0x41   : > { %s869_s3 = scalar_lea.vmem (!%p115_p8), [#allocation2], %s608_s29 }
  0x45   : > { %726 = dma.done.wait (%p804_p6), %s121_s30, 14336  }
  0x46   : > { %728 = vsyncadd (%p804_p6), %s121_s30, 4294952960  ;;  %v155_v0 = vld [vmem:[%s869_s3] sm:$0xff]  ;;  %v156_v1 = vld [vmem:[%s869_s3 + $0x8] sm:$0xff]  ;;  %s884_s16 = scalar_lea.vmem [#allocation5], %s608_s29  ;;  %s492_s23 = scalar_lea.sflag [#allocation4], %s865_s27 }
  0x47   : > { %v157_v2 = vld [vmem:[%s869_s3 + $0x10] sm:$0xff]  ;;  %v267_v3 = vadd.f32 1.0, %v155_v0  ;;  %v268_v4 = vadd.f32 1.0, %v156_v1  ;;  %v158_v6 = vld [vmem:[%s869_s3 + $0x18] sm:$0xff]  ;;  %v159_v7 = vld [vmem:[%s869_s3 + $0x20] sm:$0xff]  ;;  %s597_s25 = sshll.u32 (%p809_p9), %s786_s10, 1 }
  0x48   : > { %v269_v5 = vadd.f32 1.0, %v157_v2  ;;  %v160_v8 = vld [vmem:[%s869_s3 + $0x28] sm:$0xff]  ;;  %v270_v9 = vadd.f32 1.0, %v158_v6  ;;  %v271_v10 = vadd.f32 1.0, %v159_v7  ;;  %v161_v12 = vld [vmem:[%s869_s3 + $0x30] sm:$0xff]  ;;  %v162_v13 = vld [vmem:[%s869_s3 + $0x38] sm:$0xff] }
  0x49   : > { %v272_v11 = vadd.f32 1.0, %v160_v8  ;;  %v163_v14 = vld [vmem:[%s869_s3 + $0x40] sm:$0xff]  ;;  %379 = vst [vmem:[%s884_s16] sm:$0xff] %v267_v3  ;;  %380 = vst [vmem:[%s884_s16 + $0x8] sm:$0xff] %v268_v4  ;;  %v273_v15 = vadd.f32 1.0, %v161_v12  ;;  %v274_v16 = vadd.f32 1.0, %v162_v13  ;;  %v164_v18 = vld [vmem:[%s869_s3 + $0x48] sm:$0xff] }
  0x4a   : > { %381 = vst [vmem:[%s884_s16 + $0x10] sm:$0xff] %v269_v5  ;;  %v275_v17 = vadd.f32 1.0, %v163_v14  ;;  %v165_v19 = vld [vmem:[%s869_s3 + $0x50] sm:$0xff]  ;;  %v166_v20 = vld [vmem:[%s869_s3 + $0x58] sm:$0xff]  ;;  %382 = vst [vmem:[%s884_s16 + $0x18] sm:$0xff] %v270_v9  ;;  %v276_v21 = vadd.f32 1.0, %v164_v18 }
  0x4b   : > { %383 = vst [vmem:[%s884_s16 + $0x20] sm:$0xff] %v271_v10  ;;  %384 = vst [vmem:[%s884_s16 + $0x28] sm:$0xff] %v272_v11  ;;  %v277_v22 = vadd.f32 1.0, %v165_v19  ;;  %v278_v23 = vadd.f32 1.0, %v166_v20  ;;  %v167_v24 = vld [vmem:[%s869_s3 + $0x60] sm:$0xff]  ;;  %v168_v25 = vld [vmem:[%s869_s3 + $0x68] sm:$0xff] }
  0x4c   : > { %v169_v26 = vld [vmem:[%s869_s3 + $0x70] sm:$0xff]  ;;  %385 = vst [vmem:[%s884_s16 + $0x30] sm:$0xff] %v273_v15  ;;  %386 = vst [vmem:[%s884_s16 + $0x38] sm:$0xff] %v274_v16  ;;  %v279_v27 = vadd.f32 1.0, %v167_v24  ;;  %v280_v28 = vadd.f32 1.0, %v168_v25  ;;  %v170_v30 = vld [vmem:[%s869_s3 + $0x78] sm:$0xff] }
  0x4d   : > { %387 = vst [vmem:[%s884_s16 + $0x40] sm:$0xff] %v275_v17  ;;  %v281_v29 = vadd.f32 1.0, %v169_v26  ;;  %v171_v31 = vld [vmem:[%s869_s3 + $0x80] sm:$0xff]  ;;  %v172_v32 = vld [vmem:[%s869_s3 + $0x88] sm:$0xff]  ;;  %388 = vst [vmem:[%s884_s16 + $0x48] sm:$0xff] %v276_v21  ;;  %v282_v33 = vadd.f32 1.0, %v170_v30 }
  0x4e   : > { %389 = vst [vmem:[%s884_s16 + $0x50] sm:$0xff] %v277_v22  ;;  %390 = vst [vmem:[%s884_s16 + $0x58] sm:$0xff] %v278_v23  ;;  %v283_v34 = vadd.f32 1.0, %v171_v31  ;;  %v284_v35 = vadd.f32 1.0, %v172_v32  ;;  %v173_v36 = vld [vmem:[%s869_s3 + $0x90] sm:$0xff]  ;;  %v174_v37 = vld [vmem:[%s869_s3 + $0x98] sm:$0xff] }
  0x4f   : > { %v175_v38 = vld [vmem:[%s869_s3 + $0xa0] sm:$0xff]  ;;  %391 = vst [vmem:[%s884_s16 + $0x60] sm:$0xff] %v279_v27  ;;  %392 = vst [vmem:[%s884_s16 + $0x68] sm:$0xff] %v280_v28  ;;  %v285_v39 = vadd.f32 1.0, %v173_v36  ;;  %v286_v40 = vadd.f32 1.0, %v174_v37  ;;  %v176_v42 = vld [vmem:[%s869_s3 + $0xa8] sm:$0xff] }
  0x50   : > { %393 = vst [vmem:[%s884_s16 + $0x70] sm:$0xff] %v281_v29  ;;  %v287_v41 = vadd.f32 1.0, %v175_v38  ;;  %v177_v43 = vld [vmem:[%s869_s3 + $0xb0] sm:$0xff]  ;;  %v178_v44 = vld [vmem:[%s869_s3 + $0xb8] sm:$0xff]  ;;  %394 = vst [vmem:[%s884_s16 + $0x78] sm:$0xff] %v282_v33  ;;  %v288_v45 = vadd.f32 1.0, %v176_v42 }
  0x51   : > { %395 = vst [vmem:[%s884_s16 + $0x80] sm:$0xff] %v283_v34  ;;  %396 = vst [vmem:[%s884_s16 + $0x88] sm:$0xff] %v284_v35  ;;  %v289_v46 = vadd.f32 1.0, %v177_v43  ;;  %v290_v47 = vadd.f32 1.0, %v178_v44  ;;  %v179_v48 = vld [vmem:[%s869_s3 + $0xc0] sm:$0xff]  ;;  %v180_v49 = vld [vmem:[%s869_s3 + $0xc8] sm:$0xff] }
  0x52   : > { %v181_v50 = vld [vmem:[%s869_s3 + $0xd0] sm:$0xff]  ;;  %397 = vst [vmem:[%s884_s16 + $0x90] sm:$0xff] %v285_v39  ;;  %398 = vst [vmem:[%s884_s16 + $0x98] sm:$0xff] %v286_v40  ;;  %v291_v51 = vadd.f32 1.0, %v179_v48  ;;  %v292_v52 = vadd.f32 1.0, %v180_v49  ;;  %v182_v54 = vld [vmem:[%s869_s3 + $0xd8] sm:$0xff] }
  0x53   : > { %399 = vst [vmem:[%s884_s16 + $0xa0] sm:$0xff] %v287_v41  ;;  %v293_v53 = vadd.f32 1.0, %v181_v50  ;;  %v183_v55 = vld [vmem:[%s869_s3 + $0xe0] sm:$0xff]  ;;  %v184_v56 = vld [vmem:[%s869_s3 + $0xe8] sm:$0xff]  ;;  %400 = vst [vmem:[%s884_s16 + $0xa8] sm:$0xff] %v288_v45  ;;  %v294_v57 = vadd.f32 1.0, %v182_v54 }
  0x54   : > { %401 = vst [vmem:[%s884_s16 + $0xb0] sm:$0xff] %v289_v46  ;;  %402 = vst [vmem:[%s884_s16 + $0xb8] sm:$0xff] %v290_v47  ;;  %v295_v58 = vadd.f32 1.0, %v183_v55  ;;  %v296_v59 = vadd.f32 1.0, %v184_v56  ;;  %v185_v60 = vld [vmem:[%s869_s3 + $0xf0] sm:$0xff]  ;;  %v186_v61 = vld [vmem:[%s869_s3 + $0xf8] sm:$0xff] }
  0x55   : > { %v187_v62 = vld [vmem:[%s869_s3 + $0x100] sm:$0xff]  ;;  %403 = vst [vmem:[%s884_s16 + $0xc0] sm:$0xff] %v291_v51  ;;  %404 = vst [vmem:[%s884_s16 + $0xc8] sm:$0xff] %v292_v52  ;;  %v297_v63 = vadd.f32 1.0, %v185_v60  ;;  %v298_v0 = vadd.f32 1.0, %v186_v61  ;;  %v188_v2 = vld [vmem:[%s869_s3 + $0x108] sm:$0xff] }
  0x56   : > { %405 = vst [vmem:[%s884_s16 + $0xd0] sm:$0xff] %v293_v53  ;;  %v299_v1 = vadd.f32 1.0, %v187_v62  ;;  %v189_v3 = vld [vmem:[%s869_s3 + $0x110] sm:$0xff]  ;;  %v190_v4 = vld [vmem:[%s869_s3 + $0x118] sm:$0xff]  ;;  %406 = vst [vmem:[%s884_s16 + $0xd8] sm:$0xff] %v294_v57  ;;  %v300_v5 = vadd.f32 1.0, %v188_v2 }
  0x57   : > { %407 = vst [vmem:[%s884_s16 + $0xe0] sm:$0xff] %v295_v58  ;;  %408 = vst [vmem:[%s884_s16 + $0xe8] sm:$0xff] %v296_v59  ;;  %v301_v6 = vadd.f32 1.0, %v189_v3  ;;  %v302_v7 = vadd.f32 1.0, %v190_v4  ;;  %v191_v8 = vld [vmem:[%s869_s3 + $0x120] sm:$0xff]  ;;  %v192_v9 = vld [vmem:[%s869_s3 + $0x128] sm:$0xff] }
  0x58   : > { %v193_v10 = vld [vmem:[%s869_s3 + $0x130] sm:$0xff]  ;;  %409 = vst [vmem:[%s884_s16 + $0xf0] sm:$0xff] %v297_v63  ;;  %410 = vst [vmem:[%s884_s16 + $0xf8] sm:$0xff] %v298_v0  ;;  %v303_v11 = vadd.f32 1.0, %v191_v8  ;;  %v304_v12 = vadd.f32 1.0, %v192_v9  ;;  %v194_v14 = vld [vmem:[%s869_s3 + $0x138] sm:$0xff] }
  0x59   : > { %411 = vst [vmem:[%s884_s16 + $0x100] sm:$0xff] %v299_v1  ;;  %v305_v13 = vadd.f32 1.0, %v193_v10  ;;  %v195_v15 = vld [vmem:[%s869_s3 + $0x140] sm:$0xff]  ;;  %v196_v16 = vld [vmem:[%s869_s3 + $0x148] sm:$0xff]  ;;  %412 = vst [vmem:[%s884_s16 + $0x108] sm:$0xff] %v300_v5  ;;  %v306_v17 = vadd.f32 1.0, %v194_v14 }
  0x5a   : > { %413 = vst [vmem:[%s884_s16 + $0x110] sm:$0xff] %v301_v6  ;;  %414 = vst [vmem:[%s884_s16 + $0x118] sm:$0xff] %v302_v7  ;;  %v307_v18 = vadd.f32 1.0, %v195_v15  ;;  %v308_v19 = vadd.f32 1.0, %v196_v16  ;;  %v197_v20 = vld [vmem:[%s869_s3 + $0x150] sm:$0xff]  ;;  %v198_v21 = vld [vmem:[%s869_s3 + $0x158] sm:$0xff] }
  0x5b   : > { %v199_v22 = vld [vmem:[%s869_s3 + $0x160] sm:$0xff]  ;;  %415 = vst [vmem:[%s884_s16 + $0x120] sm:$0xff] %v303_v11  ;;  %416 = vst [vmem:[%s884_s16 + $0x128] sm:$0xff] %v304_v12  ;;  %v309_v23 = vadd.f32 1.0, %v197_v20  ;;  %v310_v24 = vadd.f32 1.0, %v198_v21  ;;  %v200_v26 = vld [vmem:[%s869_s3 + $0x168] sm:$0xff] }
  0x5c   : > { %417 = vst [vmem:[%s884_s16 + $0x130] sm:$0xff] %v305_v13  ;;  %v311_v25 = vadd.f32 1.0, %v199_v22  ;;  %v201_v27 = vld [vmem:[%s869_s3 + $0x170] sm:$0xff]  ;;  %v202_v28 = vld [vmem:[%s869_s3 + $0x178] sm:$0xff]  ;;  %418 = vst [vmem:[%s884_s16 + $0x138] sm:$0xff] %v306_v17  ;;  %v312_v29 = vadd.f32 1.0, %v200_v26 }
  0x5d   : > { %419 = vst [vmem:[%s884_s16 + $0x140] sm:$0xff] %v307_v18  ;;  %420 = vst [vmem:[%s884_s16 + $0x148] sm:$0xff] %v308_v19  ;;  %v313_v30 = vadd.f32 1.0, %v201_v27  ;;  %v314_v31 = vadd.f32 1.0, %v202_v28  ;;  %v203_v32 = vld [vmem:[%s869_s3 + $0x180] sm:$0xff]  ;;  %v204_v33 = vld [vmem:[%s869_s3 + $0x188] sm:$0xff] }
  0x5e   : > { %v205_v34 = vld [vmem:[%s869_s3 + $0x190] sm:$0xff]  ;;  %421 = vst [vmem:[%s884_s16 + $0x150] sm:$0xff] %v309_v23  ;;  %422 = vst [vmem:[%s884_s16 + $0x158] sm:$0xff] %v310_v24  ;;  %v315_v35 = vadd.f32 1.0, %v203_v32  ;;  %v316_v36 = vadd.f32 1.0, %v204_v33  ;;  %v206_v38 = vld [vmem:[%s869_s3 + $0x198] sm:$0xff] }
  0x5f   : > { %423 = vst [vmem:[%s884_s16 + $0x160] sm:$0xff] %v311_v25  ;;  %v317_v37 = vadd.f32 1.0, %v205_v34  ;;  %v207_v39 = vld [vmem:[%s869_s3 + $0x1a0] sm:$0xff]  ;;  %v208_v40 = vld [vmem:[%s869_s3 + $0x1a8] sm:$0xff]  ;;  %424 = vst [vmem:[%s884_s16 + $0x168] sm:$0xff] %v312_v29  ;;  %v318_v41 = vadd.f32 1.0, %v206_v38 }
  0x60   : > { %425 = vst [vmem:[%s884_s16 + $0x170] sm:$0xff] %v313_v30  ;;  %426 = vst [vmem:[%s884_s16 + $0x178] sm:$0xff] %v314_v31  ;;  %v319_v42 = vadd.f32 1.0, %v207_v39  ;;  %v320_v43 = vadd.f32 1.0, %v208_v40  ;;  %v209_v44 = vld [vmem:[%s869_s3 + $0x1b0] sm:$0xff]  ;;  %v210_v45 = vld [vmem:[%s869_s3 + $0x1b8] sm:$0xff] }
  0x61   : > { %v211_v46 = vld [vmem:[%s869_s3 + $0x1c0] sm:$0xff]  ;;  %427 = vst [vmem:[%s884_s16 + $0x180] sm:$0xff] %v315_v35  ;;  %428 = vst [vmem:[%s884_s16 + $0x188] sm:$0xff] %v316_v36  ;;  %v321_v47 = vadd.f32 1.0, %v209_v44  ;;  %v322_v48 = vadd.f32 1.0, %v210_v45  ;;  %v212_v50 = vld [vmem:[%s869_s3 + $0x1c8] sm:$0xff] }
  0x62   : > { %429 = vst [vmem:[%s884_s16 + $0x190] sm:$0xff] %v317_v37  ;;  %v323_v49 = vadd.f32 1.0, %v211_v46  ;;  %v213_v51 = vld [vmem:[%s869_s3 + $0x1d0] sm:$0xff]  ;;  %v214_v52 = vld [vmem:[%s869_s3 + $0x1d8] sm:$0xff]  ;;  %430 = vst [vmem:[%s884_s16 + $0x198] sm:$0xff] %v318_v41  ;;  %v324_v53 = vadd.f32 1.0, %v212_v50 }
  0x63   : > { %431 = vst [vmem:[%s884_s16 + $0x1a0] sm:$0xff] %v319_v42  ;;  %432 = vst [vmem:[%s884_s16 + $0x1a8] sm:$0xff] %v320_v43  ;;  %v325_v54 = vadd.f32 1.0, %v213_v51  ;;  %v326_v55 = vadd.f32 1.0, %v214_v52  ;;  %v215_v56 = vld [vmem:[%s869_s3 + $0x1e0] sm:$0xff]  ;;  %v216_v57 = vld [vmem:[%s869_s3 + $0x1e8] sm:$0xff] }
  0x64   : > { %v217_v58 = vld [vmem:[%s869_s3 + $0x1f0] sm:$0xff]  ;;  %433 = vst [vmem:[%s884_s16 + $0x1b0] sm:$0xff] %v321_v47  ;;  %434 = vst [vmem:[%s884_s16 + $0x1b8] sm:$0xff] %v322_v48  ;;  %v327_v59 = vadd.f32 1.0, %v215_v56  ;;  %v328_v60 = vadd.f32 1.0, %v216_v57  ;;  %v218_v62 = vld [vmem:[%s869_s3 + $0x1f8] sm:$0xff] }
  0x65   : > { %435 = vst [vmem:[%s884_s16 + $0x1c0] sm:$0xff] %v323_v49  ;;  %v329_v61 = vadd.f32 1.0, %v217_v58  ;;  %v219_v63 = vld [vmem:[%s869_s3 + $0x200] sm:$0xff]  ;;  %v220_v0 = vld [vmem:[%s869_s3 + $0x208] sm:$0xff]  ;;  %436 = vst [vmem:[%s884_s16 + $0x1c8] sm:$0xff] %v324_v53  ;;  %v330_v1 = vadd.f32 1.0, %v218_v62 }
  0x66   : > { %437 = vst [vmem:[%s884_s16 + $0x1d0] sm:$0xff] %v325_v54  ;;  %438 = vst [vmem:[%s884_s16 + $0x1d8] sm:$0xff] %v326_v55  ;;  %v331_v2 = vadd.f32 1.0, %v219_v63  ;;  %v332_v3 = vadd.f32 1.0, %v220_v0  ;;  %v221_v4 = vld [vmem:[%s869_s3 + $0x210] sm:$0xff]  ;;  %v222_v5 = vld [vmem:[%s869_s3 + $0x218] sm:$0xff] }
  0x67   : > { %v223_v6 = vld [vmem:[%s869_s3 + $0x220] sm:$0xff]  ;;  %439 = vst [vmem:[%s884_s16 + $0x1e0] sm:$0xff] %v327_v59  ;;  %440 = vst [vmem:[%s884_s16 + $0x1e8] sm:$0xff] %v328_v60  ;;  %v333_v7 = vadd.f32 1.0, %v221_v4  ;;  %v334_v8 = vadd.f32 1.0, %v222_v5  ;;  %v224_v10 = vld [vmem:[%s869_s3 + $0x228] sm:$0xff] }
  0x68   : > { %441 = vst [vmem:[%s884_s16 + $0x1f0] sm:$0xff] %v329_v61  ;;  %v335_v9 = vadd.f32 1.0, %v223_v6  ;;  %v225_v11 = vld [vmem:[%s869_s3 + $0x230] sm:$0xff]  ;;  %v226_v12 = vld [vmem:[%s869_s3 + $0x238] sm:$0xff]  ;;  %442 = vst [vmem:[%s884_s16 + $0x1f8] sm:$0xff] %v330_v1  ;;  %v336_v13 = vadd.f32 1.0, %v224_v10 }
  0x69   : > { %443 = vst [vmem:[%s884_s16 + $0x200] sm:$0xff] %v331_v2  ;;  %444 = vst [vmem:[%s884_s16 + $0x208] sm:$0xff] %v332_v3  ;;  %v337_v14 = vadd.f32 1.0, %v225_v11  ;;  %v338_v15 = vadd.f32 1.0, %v226_v12  ;;  %v227_v16 = vld [vmem:[%s869_s3 + $0x240] sm:$0xff]  ;;  %v228_v17 = vld [vmem:[%s869_s3 + $0x248] sm:$0xff] }
  0x6a   : > { %v229_v18 = vld [vmem:[%s869_s3 + $0x250] sm:$0xff]  ;;  %445 = vst [vmem:[%s884_s16 + $0x210] sm:$0xff] %v333_v7  ;;  %446 = vst [vmem:[%s884_s16 + $0x218] sm:$0xff] %v334_v8  ;;  %v339_v19 = vadd.f32 1.0, %v227_v16  ;;  %v340_v20 = vadd.f32 1.0, %v228_v17  ;;  %v230_v22 = vld [vmem:[%s869_s3 + $0x258] sm:$0xff] }
  0x6b   : > { %447 = vst [vmem:[%s884_s16 + $0x220] sm:$0xff] %v335_v9  ;;  %v341_v21 = vadd.f32 1.0, %v229_v18  ;;  %v231_v23 = vld [vmem:[%s869_s3 + $0x260] sm:$0xff]  ;;  %v232_v24 = vld [vmem:[%s869_s3 + $0x268] sm:$0xff]  ;;  %448 = vst [vmem:[%s884_s16 + $0x228] sm:$0xff] %v336_v13  ;;  %v342_v25 = vadd.f32 1.0, %v230_v22 }
  0x6c   : > { %449 = vst [vmem:[%s884_s16 + $0x230] sm:$0xff] %v337_v14  ;;  %450 = vst [vmem:[%s884_s16 + $0x238] sm:$0xff] %v338_v15  ;;  %v343_v26 = vadd.f32 1.0, %v231_v23  ;;  %v344_v27 = vadd.f32 1.0, %v232_v24  ;;  %v233_v28 = vld [vmem:[%s869_s3 + $0x270] sm:$0xff]  ;;  %v234_v29 = vld [vmem:[%s869_s3 + $0x278] sm:$0xff] }
  0x6d   : > { %v235_v30 = vld [vmem:[%s869_s3 + $0x280] sm:$0xff]  ;;  %451 = vst [vmem:[%s884_s16 + $0x240] sm:$0xff] %v339_v19  ;;  %452 = vst [vmem:[%s884_s16 + $0x248] sm:$0xff] %v340_v20  ;;  %v345_v31 = vadd.f32 1.0, %v233_v28  ;;  %v346_v32 = vadd.f32 1.0, %v234_v29  ;;  %v236_v34 = vld [vmem:[%s869_s3 + $0x288] sm:$0xff] }
  0x6e   : > { %453 = vst [vmem:[%s884_s16 + $0x250] sm:$0xff] %v341_v21  ;;  %v347_v33 = vadd.f32 1.0, %v235_v30  ;;  %v237_v35 = vld [vmem:[%s869_s3 + $0x290] sm:$0xff]  ;;  %v238_v36 = vld [vmem:[%s869_s3 + $0x298] sm:$0xff]  ;;  %454 = vst [vmem:[%s884_s16 + $0x258] sm:$0xff] %v342_v25  ;;  %v348_v37 = vadd.f32 1.0, %v236_v34 }
  0x6f   : > { %455 = vst [vmem:[%s884_s16 + $0x260] sm:$0xff] %v343_v26  ;;  %456 = vst [vmem:[%s884_s16 + $0x268] sm:$0xff] %v344_v27  ;;  %v349_v38 = vadd.f32 1.0, %v237_v35  ;;  %v350_v39 = vadd.f32 1.0, %v238_v36  ;;  %v239_v40 = vld [vmem:[%s869_s3 + $0x2a0] sm:$0xff]  ;;  %v240_v41 = vld [vmem:[%s869_s3 + $0x2a8] sm:$0xff] }
  0x70   : > { %v241_v42 = vld [vmem:[%s869_s3 + $0x2b0] sm:$0xff]  ;;  %457 = vst [vmem:[%s884_s16 + $0x270] sm:$0xff] %v345_v31  ;;  %458 = vst [vmem:[%s884_s16 + $0x278] sm:$0xff] %v346_v32  ;;  %v351_v43 = vadd.f32 1.0, %v239_v40  ;;  %v352_v44 = vadd.f32 1.0, %v240_v41  ;;  %v242_v46 = vld [vmem:[%s869_s3 + $0x2b8] sm:$0xff] }
  0x71   : > { %459 = vst [vmem:[%s884_s16 + $0x280] sm:$0xff] %v347_v33  ;;  %v353_v45 = vadd.f32 1.0, %v241_v42  ;;  %v243_v47 = vld [vmem:[%s869_s3 + $0x2c0] sm:$0xff]  ;;  %v244_v48 = vld [vmem:[%s869_s3 + $0x2c8] sm:$0xff]  ;;  %460 = vst [vmem:[%s884_s16 + $0x288] sm:$0xff] %v348_v37  ;;  %v354_v49 = vadd.f32 1.0, %v242_v46 }
  0x72   : > { %461 = vst [vmem:[%s884_s16 + $0x290] sm:$0xff] %v349_v38  ;;  %462 = vst [vmem:[%s884_s16 + $0x298] sm:$0xff] %v350_v39  ;;  %v355_v50 = vadd.f32 1.0, %v243_v47  ;;  %v356_v51 = vadd.f32 1.0, %v244_v48  ;;  %v245_v52 = vld [vmem:[%s869_s3 + $0x2d0] sm:$0xff]  ;;  %v246_v53 = vld [vmem:[%s869_s3 + $0x2d8] sm:$0xff] }
  0x73   : > { %v247_v54 = vld [vmem:[%s869_s3 + $0x2e0] sm:$0xff]  ;;  %463 = vst [vmem:[%s884_s16 + $0x2a0] sm:$0xff] %v351_v43  ;;  %464 = vst [vmem:[%s884_s16 + $0x2a8] sm:$0xff] %v352_v44  ;;  %v357_v55 = vadd.f32 1.0, %v245_v52  ;;  %v358_v56 = vadd.f32 1.0, %v246_v53  ;;  %v248_v58 = vld [vmem:[%s869_s3 + $0x2e8] sm:$0xff] }
  0x74   : > { %465 = vst [vmem:[%s884_s16 + $0x2b0] sm:$0xff] %v353_v45  ;;  %v359_v57 = vadd.f32 1.0, %v247_v54  ;;  %v249_v59 = vld [vmem:[%s869_s3 + $0x2f0] sm:$0xff]  ;;  %v250_v60 = vld [vmem:[%s869_s3 + $0x2f8] sm:$0xff]  ;;  %466 = vst [vmem:[%s884_s16 + $0x2b8] sm:$0xff] %v354_v49  ;;  %v360_v61 = vadd.f32 1.0, %v248_v58 }
  0x75   : > { %467 = vst [vmem:[%s884_s16 + $0x2c0] sm:$0xff] %v355_v50  ;;  %468 = vst [vmem:[%s884_s16 + $0x2c8] sm:$0xff] %v356_v51  ;;  %v361_v62 = vadd.f32 1.0, %v249_v59  ;;  %v362_v63 = vadd.f32 1.0, %v250_v60  ;;  %v251_v0 = vld [vmem:[%s869_s3 + $0x300] sm:$0xff]  ;;  %v252_v1 = vld [vmem:[%s869_s3 + $0x308] sm:$0xff] }
  0x76   : > { %v253_v2 = vld [vmem:[%s869_s3 + $0x310] sm:$0xff]  ;;  %469 = vst [vmem:[%s884_s16 + $0x2d0] sm:$0xff] %v357_v55  ;;  %470 = vst [vmem:[%s884_s16 + $0x2d8] sm:$0xff] %v358_v56  ;;  %v363_v3 = vadd.f32 1.0, %v251_v0  ;;  %v364_v4 = vadd.f32 1.0, %v252_v1  ;;  %v254_v6 = vld [vmem:[%s869_s3 + $0x318] sm:$0xff] }
  0x77   : > { %471 = vst [vmem:[%s884_s16 + $0x2e0] sm:$0xff] %v359_v57  ;;  %v365_v5 = vadd.f32 1.0, %v253_v2  ;;  %v255_v7 = vld [vmem:[%s869_s3 + $0x320] sm:$0xff]  ;;  %v256_v8 = vld [vmem:[%s869_s3 + $0x328] sm:$0xff]  ;;  %472 = vst [vmem:[%s884_s16 + $0x2e8] sm:$0xff] %v360_v61  ;;  %v366_v9 = vadd.f32 1.0, %v254_v6 }
  0x78   : > { %473 = vst [vmem:[%s884_s16 + $0x2f0] sm:$0xff] %v361_v62  ;;  %474 = vst [vmem:[%s884_s16 + $0x2f8] sm:$0xff] %v362_v63  ;;  %v367_v10 = vadd.f32 1.0, %v255_v7  ;;  %v368_v11 = vadd.f32 1.0, %v256_v8  ;;  %v257_v12 = vld [vmem:[%s869_s3 + $0x330] sm:$0xff]  ;;  %v258_v13 = vld [vmem:[%s869_s3 + $0x338] sm:$0xff] }
  0x79   : > { %v259_v14 = vld [vmem:[%s869_s3 + $0x340] sm:$0xff]  ;;  %475 = vst [vmem:[%s884_s16 + $0x300] sm:$0xff] %v363_v3  ;;  %476 = vst [vmem:[%s884_s16 + $0x308] sm:$0xff] %v364_v4  ;;  %v369_v15 = vadd.f32 1.0, %v257_v12  ;;  %v370_v16 = vadd.f32 1.0, %v258_v13  ;;  %v260_v18 = vld [vmem:[%s869_s3 + $0x348] sm:$0xff] }
  0x7a   : > { %477 = vst [vmem:[%s884_s16 + $0x310] sm:$0xff] %v365_v5  ;;  %v371_v17 = vadd.f32 1.0, %v259_v14  ;;  %v261_v19 = vld [vmem:[%s869_s3 + $0x350] sm:$0xff]  ;;  %v262_v20 = vld [vmem:[%s869_s3 + $0x358] sm:$0xff]  ;;  %478 = vst [vmem:[%s884_s16 + $0x318] sm:$0xff] %v366_v9  ;;  %v372_v21 = vadd.f32 1.0, %v260_v18 }
  0x7b   : > { %479 = vst [vmem:[%s884_s16 + $0x320] sm:$0xff] %v367_v10  ;;  %480 = vst [vmem:[%s884_s16 + $0x328] sm:$0xff] %v368_v11  ;;  %v373_v22 = vadd.f32 1.0, %v261_v19  ;;  %v374_v23 = vadd.f32 1.0, %v262_v20  ;;  %v263_v24 = vld [vmem:[%s869_s3 + $0x360] sm:$0xff]  ;;  %v264_v25 = vld [vmem:[%s869_s3 + $0x368] sm:$0xff] }
  0x7c   : > { %v265_v26 = vld [vmem:[%s869_s3 + $0x370] sm:$0xff]  ;;  %481 = vst [vmem:[%s884_s16 + $0x330] sm:$0xff] %v369_v15  ;;  %482 = vst [vmem:[%s884_s16 + $0x338] sm:$0xff] %v370_v16  ;;  %v375_v27 = vadd.f32 1.0, %v263_v24  ;;  %v376_v28 = vadd.f32 1.0, %v264_v25  ;;  %v266_v30 = vld [vmem:[%s869_s3 + $0x378] sm:$0xff] }
  0x7d   : > { %483 = vst [vmem:[%s884_s16 + $0x340] sm:$0xff] %v371_v17  ;;  %v377_v29 = vadd.f32 1.0, %v265_v26  ;;  %484 = vst [vmem:[%s884_s16 + $0x348] sm:$0xff] %v372_v21  ;;  %v378_v31 = vadd.f32 1.0, %v266_v30  ;;  %498 = sbr.rel (!%p809_p9) target bundleno = 161 (0xa1), region = 32  ;;  %s500_s28 = ssub.s32 (%p809_p9), 3, %s597_s25 }
  0x7e   : > { %485 = vst [vmem:[%s884_s16 + $0x350] sm:$0xff] %v373_v22  ;;  %486 = vst [vmem:[%s884_s16 + $0x358] sm:$0xff] %v374_v23  ;;  %p501_p6 = scmp.lt.s32.totalorder (%p809_p9), %s500_s28, 2 }
  0x7f   : > { %487 = vst [vmem:[%s884_s16 + $0x360] sm:$0xff] %v375_v27  ;;  %488 = vst [vmem:[%s884_s16 + $0x368] sm:$0xff] %v376_v28 }
  0x80   : > { %489 = vst [vmem:[%s884_s16 + $0x370] sm:$0xff] %v377_v29  ;;  %490 = vst [vmem:[%s884_s16 + $0x378] sm:$0xff] %v378_v31 }
  0x84   : > { %s1179_s28 = smov (!%p501_p6, %s500_s28), 2 }
  0x85   : > { %s1105_s2 = smul.u32 7168, %s1179_s28 }
  0x87   : > { %s506_s4 = ssub.s32 14336, %s1105_s2 }
  0x88   : > { %507 = vsyncadd %s492_s23, %s506_s4  ;;  %p600_p10 = scmp.ne.s32.totalorder %s1105_s2, 0  ;;  %s609_s17 = smul.u32 14336, %s786_s10 }
  0x89   : > { %s513_s5 = sshll.u32 %s884_s16, 4  ;;  %s752_s20 = smov [#allocation5]   ;;  %s1118_s5 = int_to_ptr.vmem [resolvable:$true] %s513_s5 }
  0x8a   : > { %s1116_s14 = scalar_lea.hbm %s1165_s1, %s609_s17  ;;  %s681_s19 = scalar_lea.vmem %s1118_s5, %s1105_s2 }
  0x8b   : > { %p682_p9 = scmp.ne.s32.totalorder %s1118_s5, %s681_s19  ;;  %s685_s21 = sshll.u32 %s752_s20, 4  ;;  %s686_s21 = int_to_ptr.vmem [resolvable:$false] %s685_s21 }
  0x8c   : > { %s687_s10 = scalar_lea.vmem %s686_s21, 28672  ;;  %p688_p12 = scmp.lt.s32.totalorder %s1118_s5, %s686_s21 }
  0x8d   : > { %p683_p11 = pnand %p682_p9, %p600_p10  ;;  %p689_p0 = scmp.lt.s32.totalorder %s687_s10, %s681_s19 }
  0x8f   : > { %p684_p13 = pneg %p683_p11  ;;  %p690_p1 = por %p689_p0, %p688_p12 }
  0x91   : > { %p691_p3 = pnand %p690_p1, %p684_p13 }
  0x93   : > { %694 = shalt.err (!%p691_p3)
}
  0x94   : > { %s695_s22 = scalar_lea.hbm %s1116_s14, %s1105_s2  ;;  %s699_s29 = scalar_lea.hbm %s1165_s1, 21504 }
  0x95   : > { %p696_p4 = scmp.ne.s32.totalorder %s1116_s14, %s695_s22  ;;  %p700_p7 = scmp.lt.u32.totalorder %s1116_s14, %s1165_s1 }
  0x96   : > { %p701_p8 = scmp.lt.u32.totalorder %s699_s29, %s695_s22  ;;  %p703_p9 = scmp.lt.u32.totalorder %s695_s22, %s1116_s14 }
  0x97   : > { %p697_p5 = pnand %p696_p4, %p600_p10 }
  0x98   : > { %p702_p6 = por %p701_p8, %p700_p7 }
  0x99   : > { %p698_p2 = pneg %p697_p5 }
  0x9a   : > { %p704_p11 = por %p703_p9, %p702_p6 }
  0x9c   : > { %p705_p13 = pnand %p704_p11, %p698_p2 }
  0x9e   : > { %708 = shalt.err (!%p705_p13)
}
  0x9f   : > { %s753_s16 = smov 7168   ;;  %s754_s25 = smov 448  }
  0xa0   : > { %519 = dma.vmem_to_hbm [thread:$0]  (%p600_p10), %s1118_s5, %s1105_s2, %s1116_s14, %s492_s23, %s753_s16, %s753_s16, %s754_s25  }
  0xa1 PF: > { %s528_s28 = sand.u32 1, %s735_s6   ;;  %p1170_p12 = scmp.ne.s32.totalorder %s1169_s18, 0 }
  0xa2   : > { %p1171_p0 = scmp.ge.s32.totalorder %s747_s9, 2  ;;  %s529_s4 = scalar_lea.sflag [#allocation4], %s528_s28 }
  0xa4   : > { %p613_p1 = pnand %p1171_p0, %p1170_p12 }
  0xa6   : > { %730 = dma.done.wait (!%p613_p1), %s529_s4, 14336  }
  0xa7   : > { %732 = vsyncadd (!%p613_p1), %s529_s4, 4294952960  ;;  %p14_p3 = scmp.ge.s32.totalorder %s790_s12, 4   ;;  %s1172_s6 = smov %s739_s7 }
  0xa8   : > { %s1173_s7 = smov %s743_s8  ;;  %s1174_s8 = smov %s802_s15 }
  0xa9   : > { %s1175_s9 = smov %s790_s12  ;;  %16 = sbr.rel (!%p14_p3) target bundleno = 5 (0x5), region = 69 }
  0xb0   :  { %534 = vsyncpa [#allocation3], 1 }
  0xb1   :  { %536 = vsyncpa [#allocation3 + $0x1], 1 }
  0xb2   :  { %537 = vsyncpa [#allocation4], 1 }
  0xb3   :  { %539 = vsyncpa [#allocation4 + $0x1], 1 }

</bundles_post_ra>
